<compile_context>
chip_gen: v5e
topology: v5e:2x2
jax: 0.10.0
libtpu: 0.0.40
codegen_flags: <defaults>
</compile_context>

<pallas_src>
import jax
import jax.numpy as jnp
from jax.experimental import pallas as pl
from jax.experimental.pallas import tpu as pltpu

EPS = 1e-5
OUT_PAD = 8  # narrow, 8-wide padded output (true output_dim=7 sliced in wrapper)


def _round_up(n, m):
    return ((n + m - 1) // m) * m


# --------------------------------------------------------------------------
# Kernel
# --------------------------------------------------------------------------
def _mlp_kernel(x_ref,
                w1_ref, b1_ref,
                w2_ref, b2_ref,
                w3_ref, b3_ref,
                w4_ref, b4_ref,
                o_ref):
    # BatchNorm is already folded into (W, b) by the wrapper.
    # Dropout is identity in inference mode.
    # TODO(synk): training-mode dropout (pltpu.prng_random_bits mask) not emitted.
    h = x_ref[...]  # f32 activations throughout; only the dot LHS is bf16.

    def layer(h_f32, w_ref, b_ref):
        # bf16 MXU operands, f32 accumulation; bias add + ReLU in f32.
        acc = jnp.dot(h_f32.astype(jnp.bfloat16), w_ref[...],
                      preferred_element_type=jnp.float32)
        return jnp.maximum(acc + b_ref[...], 0.0)

    h = layer(h, w1_ref, b1_ref)
    h = layer(h, w2_ref, b2_ref)
    h = layer(h, w3_ref, b3_ref)

    out = jnp.dot(h.astype(jnp.bfloat16), w4_ref[...],
                  preferred_element_type=jnp.float32) + b4_ref[...]
    o_ref[...] = out.astype(o_ref.dtype)


# --------------------------------------------------------------------------
# Wrapper
# --------------------------------------------------------------------------
def _fold_bn(w, b, gamma, beta, mean, var, eps=EPS):
    """Fold BatchNorm1d (running stats) into the preceding Linear."""
    scale = gamma * jax.lax.rsqrt(var + eps)            # [1, C]
    w_f = w * scale                                     # [in, C] * [1, C]
    b_f = (b - mean) * scale + beta                     # [1, C]
    return w_f, b_f


def _pick_tb(batch, block_rows):
    """Batch tile: multiple of 8, big enough to amortize per-step overhead,
    but capped so the grid has >= 2 steps whenever B > 8 (v7x megacore)."""
    if batch <= 8:
        return batch
    tb = _round_up(pl.cdiv(batch, 2), 8)
    return max(8, min(block_rows, tb))


def mlp_forward(x, params, *, block_rows=8192):
    """x: [B, input_dim] float32.  params: flat list from init_params."""
    (w1, b1, g1, be1, m1, v1,
     w2, b2, g2, be2, m2, v2,
     w3, b3, g3, be3, m3, v3,
     w4, b4) = params

    # --- fold BN into the first three Linears (outside the kernel, once) ---
    w1f, b1f = _fold_bn(w1, b1, g1, be1, m1, v1)
    w2f, b2f = _fold_bn(w2, b2, g2, be2, m2, v2)
    w3f, b3f = _fold_bn(w3, b3, g3, be3, m3, v3)

    out_dim = w4.shape[1]
    # --- pad the final layer to a narrow 8-wide output (masked vst is fine;
    #     writeback bytes are what matter for this mem-bound kernel) ---
    w4p = jnp.zeros((w4.shape[0], OUT_PAD), jnp.float32).at[:, :out_dim].set(w4)
    b4p = jnp.zeros((1, OUT_PAD), jnp.float32).at[:, :out_dim].set(b4)

    # bf16 matmul operands (tiny, batch-independent cast); biases stay f32.
    weights = [w.astype(jnp.bfloat16) for w in (w1f, w2f, w3f, w4p)]
    biases = [b1f, b2f, b3f, b4p]

    B, in_dim = x.shape
    TB = _pick_tb(B, block_rows)
    grid = (pl.cdiv(B, TB),)  # ragged last block handled by Pallas; no jnp.pad

    # x / out are tiled over the batch grid; weights & biases use a constant
    # index_map so they stay resident in VMEM across grid steps.
    in_specs = [pl.BlockSpec((TB, in_dim), lambda i: (i, 0))]
    operands = [x]
    for w, b in zip(weights, biases):
        in_specs.append(pl.BlockSpec(w.shape, lambda i: (0, 0)))
        in_specs.append(pl.BlockSpec(b.shape, lambda i: (0, 0)))
        operands.extend([w, b])

    out_spec = pl.BlockSpec((TB, OUT_PAD), lambda i: (i, 0))

    flops = 2 * B * (in_dim * 64 + 64 * 128 + 128 * 64 + 64 * OUT_PAD)
    bytes_accessed = (B * in_dim * 4 + B * OUT_PAD * 4
                      + sum(int(w.size) * w.dtype.itemsize for w in weights)
                      + sum(int(b.size) * b.dtype.itemsize for b in biases))

    out = pl.pallas_call(
        _mlp_kernel,
        out_shape=jax.ShapeDtypeStruct((B, OUT_PAD), jnp.float32),
        grid=grid,
        in_specs=in_specs,
        out_specs=out_spec,
        compiler_params=pltpu.CompilerParams(
            dimension_semantics=("parallel",)),
        cost_estimate=pl.CostEstimate(
            flops=flops, transcendentals=0, bytes_accessed=bytes_accessed),
    )(*operands)

    return out[:, :out_dim]


# --------------------------------------------------------------------------
# Parameter init (mirrors the PyTorch module's shapes)
# --------------------------------------------------------------------------
def init_params(key, input_dim=16, output_dim=7):
    dims = [(input_dim, 64), (64, 128), (128, 64), (64, output_dim)]
    keys = jax.random.split(key, len(dims) * 2)
    flat = []
    for i, (d_in, d_out) in enumerate(dims):
        bound = 1.0 / jnp.sqrt(jnp.float32(d_in))
        w = jax.random.uniform(keys[2 * i], (d_in, d_out), jnp.float32, -bound, bound)
        b = jax.random.uniform(keys[2 * i + 1], (1, d_out), jnp.float32, -bound, bound)
        flat.extend([w, b])
        if i < 3:  # BN after the first three Linear layers
            c = d_out
            gamma = jnp.ones((1, c), jnp.float32)
            beta = jnp.zeros((1, c), jnp.float32)
            running_mean = jnp.zeros((1, c), jnp.float32)
            running_var = jnp.ones((1, c), jnp.float32)
            flat.extend([gamma, beta, running_mean, running_var])
    return flat


# --------------------------------------------------------------------------
# Pure-JAX f32 reference (un-fused BN) for validation
# --------------------------------------------------------------------------
def reference_forward(x, params):
    (w1, b1, g1, be1, m1, v1,
     w2, b2, g2, be2, m2, v2,
     w3, b3, g3, be3, m3, v3,
     w4, b4) = params

    def block(h, w, b, g, be, m, v):
        h = h @ w + b
        h = (h - m) * (g * jax.lax.rsqrt(v + EPS)) + be
        return jnp.maximum(h, 0.0)

    h = block(x, w1, b1, g1, be1, m1, v1)
    h = block(h, w2, b2, g2, be2, m2, v2)
    h = block(h, w3, b3, g3, be3, m3, v3)
    return h @ w4 + b4


if __name__ == "__main__":
    key = jax.random.PRNGKey(0)
    k_x, k_x2, k_p = jax.random.split(key, 3)

    B, INPUT_DIM, OUTPUT_DIM = 8, 16, 7
    x = jax.random.normal(k_x, (B, INPUT_DIM), jnp.float32)
    params = init_params(k_p, INPUT_DIM, OUTPUT_DIM)

    out = jax.block_until_ready(mlp_forward(x, params))
    ref = reference_forward(x, params)
    assert out.shape == (B, OUTPUT_DIM), out.shape
    # bf16 MXU operands (f32 activations) -> ~1e-2-level deviation from f32 ref.
    assert jnp.allclose(out, ref, atol=2e-2, rtol=2e-2), "mismatch vs reference"

    # Second check: non-tile-aligned batch with a multi-step grid and a ragged
    # last block (exercises cdiv grid + masked boundary stores, no jnp.pad).
    B2 = 40
    x2 = jax.random.normal(k_x2, (B2, INPUT_DIM), jnp.float32)
    out2 = jax.block_until_ready(mlp_forward(x2, params, block_rows=16))
    ref2 = reference_forward(x2, params)
    assert out2.shape == (B2, OUTPUT_DIM), out2.shape
    assert jnp.allclose(out2, ref2, atol=2e-2, rtol=2e-2), "mismatch vs reference (tiled)"

    print("KERNEL_OK")
</pallas_src>

<mosaic_0001>
module attributes {stable_mosaic.version = 11 : i64} {
  func.func @_mlp_kernel(%arg0: i32, %arg1: memref<8x16xf32, #tpu.memory_space<vmem>>, %arg2: memref<16x64xbf16, #tpu.memory_space<vmem>>, %arg3: memref<1x64xf32, #tpu.memory_space<vmem>>, %arg4: memref<64x128xbf16, #tpu.memory_space<vmem>>, %arg5: memref<1x128xf32, #tpu.memory_space<vmem>>, %arg6: memref<128x64xbf16, #tpu.memory_space<vmem>>, %arg7: memref<1x64xf32, #tpu.memory_space<vmem>>, %arg8: memref<64x8xbf16, #tpu.memory_space<vmem>>, %arg9: memref<1x8xf32, #tpu.memory_space<vmem>>, %arg10: memref<8x8xf32, #tpu.memory_space<vmem>>) attributes {dimension_semantics = [#tpu.dimension_semantics<parallel>], iteration_bounds = array<i64: 1>, scalar_prefetch = 0 : i64, scratch_operands = 0 : i64, tpu.core_type = #tpu.core_type<tc>, window_params = [{transform_indices = @transform_0, window_bounds = array<i64: 8, 16>}, {pipeline_mode = #tpu.pipeline_mode<synchronous>, transform_indices = @transform_1, window_bounds = array<i64: 16, 64>}, {pipeline_mode = #tpu.pipeline_mode<synchronous>, transform_indices = @transform_2, window_bounds = array<i64: 1, 64>}, {pipeline_mode = #tpu.pipeline_mode<synchronous>, transform_indices = @transform_3, window_bounds = array<i64: 64, 128>}, {pipeline_mode = #tpu.pipeline_mode<synchronous>, transform_indices = @transform_4, window_bounds = array<i64: 1, 128>}, {pipeline_mode = #tpu.pipeline_mode<synchronous>, transform_indices = @transform_5, window_bounds = array<i64: 128, 64>}, {pipeline_mode = #tpu.pipeline_mode<synchronous>, transform_indices = @transform_6, window_bounds = array<i64: 1, 64>}, {pipeline_mode = #tpu.pipeline_mode<synchronous>, transform_indices = @transform_7, window_bounds = array<i64: 64, 8>}, {pipeline_mode = #tpu.pipeline_mode<synchronous>, transform_indices = @transform_8, window_bounds = array<i64: 1, 8>}, {transform_indices = @transform_9, window_bounds = array<i64: 8, 8>}]} {
    %c0 = arith.constant 0 : index
    %c0_0 = arith.constant 0 : index
    %0 = vector.load %arg1[%c0, %c0_0] : memref<8x16xf32, #tpu.memory_space<vmem>>, vector<8x16xf32>
    %1 = arith.truncf %0 : vector<8x16xf32> to vector<8x16xbf16>
    %c0_1 = arith.constant 0 : index
    %c0_2 = arith.constant 0 : index
    %2 = vector.load %arg2[%c0_1, %c0_2] : memref<16x64xbf16, #tpu.memory_space<vmem>>, vector<16x64xbf16>
    %cst = arith.constant dense<0.000000e+00> : vector<8x64xf32>
    %3 = tpu.matmul %1, %2, %cst {dimension_numbers = #tpu.dot_dimension_numbers<[1], [0], [0], [1], [0, 0, 1, 1], [], []>} : vector<8x16xbf16>, vector<16x64xbf16>, vector<8x64xf32> -> vector<8x64xf32>
    %c0_3 = arith.constant 0 : index
    %c0_4 = arith.constant 0 : index
    %4 = vector.load %arg3[%c0_3, %c0_4] : memref<1x64xf32, #tpu.memory_space<vmem>>, vector<1x64xf32>
    %5 = vector.broadcast %4 : vector<1x64xf32> to vector<8x64xf32>
    %6 = arith.addf %3, %5 : vector<8x64xf32>
    %cst_5 = arith.constant 0.000000e+00 : f32
    %7 = vector.broadcast %cst_5 : f32 to vector<8x64xf32>
    %8 = arith.maximumf %6, %7 : vector<8x64xf32>
    %9 = arith.truncf %8 : vector<8x64xf32> to vector<8x64xbf16>
    %c0_6 = arith.constant 0 : index
    %c0_7 = arith.constant 0 : index
    %10 = vector.load %arg4[%c0_6, %c0_7] : memref<64x128xbf16, #tpu.memory_space<vmem>>, vector<64x128xbf16>
    %cst_8 = arith.constant dense<0.000000e+00> : vector<8x128xf32>
    %11 = tpu.matmul %9, %10, %cst_8 {dimension_numbers = #tpu.dot_dimension_numbers<[1], [0], [0], [1], [0, 0, 1, 1], [], []>} : vector<8x64xbf16>, vector<64x128xbf16>, vector<8x128xf32> -> vector<8x128xf32>
    %c0_9 = arith.constant 0 : index
    %c0_10 = arith.constant 0 : index
    %12 = vector.load %arg5[%c0_9, %c0_10] : memref<1x128xf32, #tpu.memory_space<vmem>>, vector<1x128xf32>
    %13 = vector.broadcast %12 : vector<1x128xf32> to vector<8x128xf32>
    %14 = arith.addf %11, %13 : vector<8x128xf32>
    %cst_11 = arith.constant 0.000000e+00 : f32
    %15 = vector.broadcast %cst_11 : f32 to vector<8x128xf32>
    %16 = arith.maximumf %14, %15 : vector<8x128xf32>
    %17 = arith.truncf %16 : vector<8x128xf32> to vector<8x128xbf16>
    %c0_12 = arith.constant 0 : index
    %c0_13 = arith.constant 0 : index
    %18 = vector.load %arg6[%c0_12, %c0_13] : memref<128x64xbf16, #tpu.memory_space<vmem>>, vector<128x64xbf16>
    %cst_14 = arith.constant dense<0.000000e+00> : vector<8x64xf32>
    %19 = tpu.matmul %17, %18, %cst_14 {dimension_numbers = #tpu.dot_dimension_numbers<[1], [0], [0], [1], [0, 0, 1, 1], [], []>} : vector<8x128xbf16>, vector<128x64xbf16>, vector<8x64xf32> -> vector<8x64xf32>
    %c0_15 = arith.constant 0 : index
    %c0_16 = arith.constant 0 : index
    %20 = vector.load %arg7[%c0_15, %c0_16] : memref<1x64xf32, #tpu.memory_space<vmem>>, vector<1x64xf32>
    %21 = vector.broadcast %20 : vector<1x64xf32> to vector<8x64xf32>
    %22 = arith.addf %19, %21 : vector<8x64xf32>
    %cst_17 = arith.constant 0.000000e+00 : f32
    %23 = vector.broadcast %cst_17 : f32 to vector<8x64xf32>
    %24 = arith.maximumf %22, %23 : vector<8x64xf32>
    %25 = arith.truncf %24 : vector<8x64xf32> to vector<8x64xbf16>
    %c0_18 = arith.constant 0 : index
    %c0_19 = arith.constant 0 : index
    %26 = vector.load %arg8[%c0_18, %c0_19] : memref<64x8xbf16, #tpu.memory_space<vmem>>, vector<64x8xbf16>
    %cst_20 = arith.constant dense<0.000000e+00> : vector<8x8xf32>
    %27 = tpu.matmul %25, %26, %cst_20 {dimension_numbers = #tpu.dot_dimension_numbers<[1], [0], [0], [1], [0, 0, 1, 1], [], []>} : vector<8x64xbf16>, vector<64x8xbf16>, vector<8x8xf32> -> vector<8x8xf32>
    %c0_21 = arith.constant 0 : index
    %c0_22 = arith.constant 0 : index
    %28 = vector.load %arg9[%c0_21, %c0_22] : memref<1x8xf32, #tpu.memory_space<vmem>>, vector<1x8xf32>
    %29 = vector.broadcast %28 : vector<1x8xf32> to vector<8x8xf32>
    %30 = arith.addf %27, %29 : vector<8x8xf32>
    %c0_23 = arith.constant 0 : index
    %c0_24 = arith.constant 0 : index
    %31 = vector.load %arg10[%c0_23, %c0_24] : memref<8x8xf32, #tpu.memory_space<vmem>>, vector<8x8xf32>
    tpu.vector_store %arg10[%c0_23, %c0_24], %30 {strides = array<i32>} : memref<8x8xf32, #tpu.memory_space<vmem>>, vector<8x8xf32>,
    return
  }
  func.func @transform_0(%arg0: i32) -> (i32, i32) {
    %c0_i32 = arith.constant 0 : i32
    %c0_i32_0 = arith.constant 0 : i32
    return %arg0, %c0_i32 : i32, i32
  }
  func.func @transform_1(%arg0: i32) -> (i32, i32) {
    %c0_i32 = arith.constant 0 : i32
    %c0_i32_0 = arith.constant 0 : i32
    %c0_i32_1 = arith.constant 0 : i32
    return %c0_i32, %c0_i32_0 : i32, i32
  }
  func.func @transform_2(%arg0: i32) -> (i32, i32) {
    %c0_i32 = arith.constant 0 : i32
    %c0_i32_0 = arith.constant 0 : i32
    %c0_i32_1 = arith.constant 0 : i32
    return %c0_i32, %c0_i32_0 : i32, i32
  }
  func.func @transform_3(%arg0: i32) -> (i32, i32) {
    %c0_i32 = arith.constant 0 : i32
    %c0_i32_0 = arith.constant 0 : i32
    %c0_i32_1 = arith.constant 0 : i32
    return %c0_i32, %c0_i32_0 : i32, i32
  }
  func.func @transform_4(%arg0: i32) -> (i32, i32) {
    %c0_i32 = arith.constant 0 : i32
    %c0_i32_0 = arith.constant 0 : i32
    %c0_i32_1 = arith.constant 0 : i32
    return %c0_i32, %c0_i32_0 : i32, i32
  }
  func.func @transform_5(%arg0: i32) -> (i32, i32) {
    %c0_i32 = arith.constant 0 : i32
    %c0_i32_0 = arith.constant 0 : i32
    %c0_i32_1 = arith.constant 0 : i32
    return %c0_i32, %c0_i32_0 : i32, i32
  }
  func.func @transform_6(%arg0: i32) -> (i32, i32) {
    %c0_i32 = arith.constant 0 : i32
    %c0_i32_0 = arith.constant 0 : i32
    %c0_i32_1 = arith.constant 0 : i32
    return %c0_i32, %c0_i32_0 : i32, i32
  }
  func.func @transform_7(%arg0: i32) -> (i32, i32) {
    %c0_i32 = arith.constant 0 : i32
    %c0_i32_0 = arith.constant 0 : i32
    %c0_i32_1 = arith.constant 0 : i32
    return %c0_i32, %c0_i32_0 : i32, i32
  }
  func.func @transform_8(%arg0: i32) -> (i32, i32) {
    %c0_i32 = arith.constant 0 : i32
    %c0_i32_0 = arith.constant 0 : i32
    %c0_i32_1 = arith.constant 0 : i32
    return %c0_i32, %c0_i32_0 : i32, i32
  }
  func.func @transform_9(%arg0: i32) -> (i32, i32) {
    %c0_i32 = arith.constant 0 : i32
    %c0_i32_0 = arith.constant 0 : i32
    return %arg0, %c0_i32 : i32, i32
  }
}

</mosaic_0001>

<bundles_post_ra>
// kernel: tpu_custom_call.1
= control target key start
LH: loop header
LB: loop body
LE: loop exit
PB: predicated region body
PF: predicated region fallthrough
CT: control target
= control target key end

     0   :  { %vm48_vm0 = vcmask 130048   ;;  %s516_s0 = inlined_call_operand.vmem [shape: f32[8,16], index: 0, kind: input, shape index: {}]   ;;  %s517_s1 = inlined_call_operand.vmem [shape: bf16[16,64], index: 1, kind: input, shape index: {}]   ;;  %s518_s2 = inlined_call_operand.vmem [shape: f32[1,64], index: 2, kind: input, shape index: {}]   ;;  %s519_s3 = inlined_call_operand.vmem [shape: bf16[64,128], index: 3, kind: input, shape index: {}]   ;;  %s520_s4 = inlined_call_operand.vmem [shape: f32[1,128], index: 4, kind: input, shape index: {}]   ;;  %s521_s5 = inlined_call_operand.vmem [shape: bf16[128,64], index: 5, kind: input, shape index: {}]   ;;  %s522_s6 = inlined_call_operand.vmem [shape: f32[1,64], index: 6, kind: input, shape index: {}]   ;;  %s523_s7 = inlined_call_operand.vmem [shape: bf16[64,8], index: 7, kind: input, shape index: {}]   ;;  %s524_s8 = inlined_call_operand.vmem [shape: f32[1,8], index: 8, kind: input, shape index: {}]   ;;  %s525_s9 = inlined_call_operand.hbm [shape: f32[8,8], index: 9, kind: output, shape index: {}]  }
   0x1   :  { %v346_v0 = vld [vmem:[%s517_s1] sm:$0xff]  ;;  %v350_v2 = vld [vmem:[%s519_s3 + $0x18] sm:$0xff]  ;;  %v349_v4 = vld [vmem:[%s519_s3 + $0x10] sm:$0xff] }
   0x2   :  { %v34_v1 = vld [vmem:[%s516_s0] sm:$0xff]  ;;  %59 = vmatpush.bf16.msra.mxu0 %v346_v0  ;;  %111 = vmatpush.bf16.msra.mxu1 %v350_v2 }
   0x3   :  { %v35_v3 = vpack.c.bf16 %v34_v1, %v34_v1 }
   0x4   :  { %14 = vsyncpa [#allocation3], 0  ;;  %v348_v5 = vld [vmem:[%s519_s3 + $0x8] sm:$0xff]  ;;  %v347_v6 = vld [vmem:[%s519_s3] sm:$0xff]  ;;  %vm103_vm1 = vcmask 523264   ;;  %s394_s24 = smov [#allocation2]  }
   0x5   :  { %279 = vmatmul.msk.bf16.vlgmr.msra.gmra.mxu0 %vm48_vm0, %v35_v3  ;;  %v358_v7 = vld [vmem:[%s521_s5 + $0x38] sm:$0xff]  ;;  %v357_v8 = vld [vmem:[%s521_s5 + $0x30] sm:$0xff]  ;;  %v356_v9 = vld [vmem:[%s521_s5 + $0x28] sm:$0xff]  ;;  %s264_s25 = sshll.u32 %s394_s24, 4  ;;  %s266_s3 = sshll.u32 %s525_s9, 4  ;;  %vm257_vm2 = vcmask 64512   ;;  %s265_s25 = int_to_ptr.vmem [resolvable:$true] %s264_s25  ;;  %s267_s3 = int_to_ptr.hbm [resolvable:$true] %s266_s3 }
   0x6   :  { %112 = vmatpush.bf16.msra.mxu1 %v349_v4  ;;  %190 = vmatpush.bf16.msra.mxu2 %v358_v7  ;;  %v355_v10 = vld [vmem:[%s521_s5 + $0x20] sm:$0xff]  ;;  %v354_v11 = vld [vmem:[%s521_s5 + $0x18] sm:$0xff]  ;;  %v353_v12 = vld [vmem:[%s521_s5 + $0x10] sm:$0xff] }
   0x7   :  { %v364_v13 = vld [vmem:[%s518_s2] ss:$0 sm:$0xff]  ;;  %v352_v19 = vld [vmem:[%s521_s5 + $0x8] sm:$0xff]  ;;  %v362_v21 = vld [vmem:[%s523_s7 + $0x18] sm:$0xff] }
   0x8   :  { %v351_v20 = vld [vmem:[%s521_s5] sm:$0xff]  ;;  %248 = vmatpush.bf16.msra.mxu3 %v362_v21  ;;  %v361_v22 = vld [vmem:[%s523_s7 + $0x10] sm:$0xff]  ;;  %v360_v29 = vld [vmem:[%s523_s7 + $0x8] sm:$0xff] }
   0x9   :  { %v365_v23 = vld [vmem:[%s520_s4] ss:$0 sm:$0xff] }
   0xa   :  { %113 = vmatpush.bf16.msra.mxu1 %v348_v5  ;;  %191 = vmatpush.bf16.msra.mxu2 %v357_v8  ;;  %v359_v30 = vld [vmem:[%s523_s7] sm:$0xff] }
   0xb   :  { %v366_v31 = vld [vmem:[%s522_s6] ss:$0 sm:$0xff] }
   0xc   :  { %249 = vmatpush.bf16.msra.mxu3 %v361_v22  ;;  %v367_v37 = vld [vmem:[%s524_s8] ss:$0 sm:$0xff] }
   0xe   :  { %114 = vmatpush.bf16.msra.mxu1 %v347_v6  ;;  %192 = vmatpush.bf16.msra.mxu2 %v356_v9 }
  0x10   :  { %250 = vmatpush.bf16.msra.mxu3 %v360_v29 }
  0x12   :  { %193 = vmatpush.bf16.msra.mxu2 %v355_v10 }
  0x14   :  { %251 = vmatpush.bf16.msra.mxu3 %v359_v30 }
  0x16   :  { %194 = vmatpush.bf16.msra.mxu2 %v354_v11 }
  0x1a   :  { %195 = vmatpush.bf16.msra.mxu2 %v353_v12 }
  0x1e   :  { %196 = vmatpush.bf16.msra.mxu2 %v352_v19 }
  0x22   :  { %197 = vmatpush.bf16.msra.mxu2 %v351_v20 }
  0x82   :  { %v61_v14 = vpop.f32.mrf.mxu0 }
  0x83   :  { %v62_v15 = vadd.f32 %v364_v13, %v61_v14 }
  0x85   :  { %v65_v16 = vmax.f32 %v62_v15, 0.0 }
  0x87   :  { %v66_v17 = vpack.c.bf16 %v65_v16, %v65_v16 }
  0x89   :  { %296 = vmatmul.msk.bf16.vlgmr.msra.gmra.mxu1 %vm103_vm1, %v66_v17 }
  0x8a   :  { %v63_v18 = vpop.f32.mrf.mxu0 }
 0x106   :  { %v116_v24 = vpop.f32.mrf.mxu1 }
 0x107   :  { %v117_v25 = vadd.f32 %v365_v23, %v116_v24 }
 0x109   :  { %v120_v26 = vmax.f32 %v117_v25, 0.0 }
 0x10b   :  { %v121_v27 = vpack.c.bf16 %v120_v26, %v120_v26 }
 0x10d   :  { %198 = vmatmul.bf16.vlgmr.msra.gmra.mxu2 %v121_v27 }
 0x10e   :  { %v118_v28 = vpop.f32.mrf.mxu1 }
 0x190   :  { %v199_v32 = vpop.f32.mrf.mxu2 }
 0x191   :  { %v200_v33 = vadd.f32 %v366_v31, %v199_v32 }
 0x193   :  { %v203_v34 = vmax.f32 %v200_v33, 0.0 }
 0x195   :  { %v204_v35 = vpack.c.bf16 %v203_v34, %v203_v34 }
 0x197   :  { %345 = vmatmul.msk.bf16.vlgmr.msra.gmra.mxu3 %vm103_vm1, %v204_v35 }
 0x198   :  { %v201_v36 = vpop.f32.mrf.mxu2 }
 0x21a   :  { %v253_v38 = vpop.f32.mrf.mxu3 }
 0x21b   :  { %v254_v39 = vadd.f32 %v367_v37, %v253_v38 }
 0x21d   :  { %258 = vst.msk [vmem:[#allocation2] sm:$0xff] %vm257_vm2, %v254_v39 }
 0x21e   :  { %269 = dma.vmem_to_hbm [thread:$0]  %s265_s25, 128, %s267_s3, [#allocation3]  }
 0x222   :  { %v255_v40 = vpop.f32.mrf.mxu3 }
 0x223   :  { %392 = dma.done.wait [#allocation3], 128  }
 0x224   :  { %393 = vsyncadd [#allocation3], 4294967168 }
 0x225   :  { %274 = vsyncpa [#allocation3], 1 }

</bundles_post_ra>
